<compile_context>
chip_gen: v5e
topology: v5e:2x2
jax: 0.10.0
libtpu: 0.0.40
codegen_flags: <defaults>
</compile_context>

<pallas_src>
from functools import partial
import math

import jax
import jax.numpy as jnp
from jax.experimental import pallas as pl
from jax.experimental.pallas import tpu as pltpu


def _round_up(x, m):
    return ((x + m - 1) // m) * m


def _residual_lin_kernel(x_ref, w_ref, b_ref, o_ref, *, f_out):
    # x_ref: (block_rows, F_in)  w_ref: (F_in, 2*F_out)  b_ref: (1, 2*F_out)
    # One fused matmul for both branches; f32 accumulation on the MXU.
    z = jnp.dot(x_ref[...], w_ref[...], preferred_element_type=jnp.float32)
    z = z + b_ref[...].astype(jnp.float32)
    main = jnp.maximum(z[:, :f_out], 0.0)   # Linear -> ReLU   (main path)
    shortcut = z[:, f_out:]                 # Linear only      (shortcut path)
    o_ref[...] = (main + shortcut).astype(o_ref.dtype)


def fuse_residual_lin_params(w_main, b_main, w_sc, b_sc):
    """Fuse main + shortcut Linear parameters ONCE (at parameter-init time).

    w_*: (F_in, F_out) in (in, out) layout (= PyTorch weight.T); b_*: (F_out,)
    Returns (w_cat, b_cat) with shapes (F_in, 2*F_out), (1, 2*F_out).
    """
    w_cat = jnp.concatenate([w_main, w_sc], axis=1)
    b_cat = jnp.concatenate([b_main, b_sc]).reshape(1, -1)
    return w_cat, b_cat


def residual_lin_block(x, w_cat, b_cat):
    """ResidualLinBlock forward using pre-fused parameters.

    x      : (..., F_in)
    w_cat  : (F_in, 2*F_out)   from fuse_residual_lin_params
    b_cat  : (1, 2*F_out)
    returns: (..., F_out) = relu(x @ W_main + b_main) + x @ W_sc + b_sc
    """
    lead = x.shape[:-1]
    f_in = x.shape[-1]
    two_f_out = w_cat.shape[-1]
    f_out = two_f_out // 2

    # Flatten all leading dims into matmul rows.
    m = int(math.prod(lead)) if lead else 1
    x2 = x.reshape(m, f_in)

    # Row tiling:
    #  * small M  -> single block (grid is a sequential loop on v5e/v6e;
    #    splitting only adds per-step overhead)
    #  * large M  -> ~<=2048-row blocks, even grid count so v7x megacore
    #    splits the work 50/50 across its two TensorCores.
    # Partial last blocks are fine: Pallas pads OOB reads and drops OOB
    # writes, so no wrapper-side jnp.pad / output-slice copies are needed.
    if m <= 1024:
        block_rows = _round_up(max(m, 1), 8)
        grid = 1
    else:
        grid = max(2, 2 * pl.cdiv(m, 2 * 2048))          # even block count
        block_rows = _round_up(pl.cdiv(m, grid), 8)
        grid = pl.cdiv(m, block_rows)                    # no empty tail block

    in_bytes = jnp.dtype(x.dtype).itemsize
    w_bytes = jnp.dtype(w_cat.dtype).itemsize
    cost = pl.CostEstimate(
        flops=2 * m * f_in * two_f_out + 2 * m * f_out,
        transcendentals=0,
        bytes_accessed=(in_bytes * m * f_in
                        + w_bytes * (f_in * two_f_out + two_f_out)
                        + in_bytes * m * f_out),
    )

    out2 = pl.pallas_call(
        partial(_residual_lin_kernel, f_out=f_out),
        out_shape=jax.ShapeDtypeStruct((m, f_out), x.dtype),
        grid=(grid,),
        in_specs=[
            pl.BlockSpec((block_rows, f_in), lambda i: (i, 0)),
            pl.BlockSpec((f_in, two_f_out), lambda i: (0, 0)),   # VMEM-resident
            pl.BlockSpec((1, two_f_out), lambda i: (0, 0)),
        ],
        out_specs=pl.BlockSpec((block_rows, f_out), lambda i: (i, 0)),
        compiler_params=pltpu.CompilerParams(
            dimension_semantics=("parallel",)),
        cost_estimate=cost,
    )(x2, w_cat, b_cat)

    return out2.reshape(*lead, f_out)


def _reference(x, w_main, b_main, w_sc, b_sc):
    """Pure-JAX reference for correctness checking."""
    main = jnp.maximum(x @ w_main + b_main, 0.0)
    shortcut = x @ w_sc + b_sc
    return main + shortcut


if __name__ == "__main__":
    B, S, F_IN, F_OUT = 2, 8, 32, 128   # batch=2, seq=8, in=32 -> out=128

    key = jax.random.PRNGKey(0)
    kx, kw1, kb1, kw2, kb2 = jax.random.split(key, 5)

    x = jax.random.normal(kx, (B, S, F_IN), dtype=jnp.float32)
    # Deterministic synthetic parameters, same shapes as Linear(F_IN, F_OUT)
    # weight/bias (stored here in (in, out) layout = PyTorch weight.T).
    bound = 1.0 / (F_IN ** 0.5)
    w_main = jax.random.uniform(kw1, (F_IN, F_OUT), jnp.float32, -bound, bound)
    b_main = jax.random.uniform(kb1, (F_OUT,), jnp.float32, -bound, bound)
    w_sc = jax.random.uniform(kw2, (F_IN, F_OUT), jnp.float32, -bound, bound)
    b_sc = jax.random.uniform(kb2, (F_OUT,), jnp.float32, -bound, bound)

    # Parameter fusion happens once, outside the per-call path.
    w_cat, b_cat = fuse_residual_lin_params(w_main, b_main, w_sc, b_sc)

    out = residual_lin_block(x, w_cat, b_cat)
    out = jax.block_until_ready(out)

    ref = _reference(x, w_main, b_main, w_sc, b_sc)
    assert out.shape == (B, S, F_OUT), out.shape
    assert jnp.allclose(out, ref, atol=1e-3, rtol=1e-3), "mismatch vs reference"

    print("KERNEL_OK")
</pallas_src>

<mosaic_0001>
module attributes {stable_mosaic.version = 11 : i64} {
  func.func @_residual_lin_kernel(%arg0: i32, %arg1: memref<16x32xf32, #tpu.memory_space<vmem>>, %arg2: memref<32x256xf32, #tpu.memory_space<vmem>>, %arg3: memref<1x256xf32, #tpu.memory_space<vmem>>, %arg4: memref<16x128xf32, #tpu.memory_space<vmem>>) attributes {dimension_semantics = [#tpu.dimension_semantics<parallel>], iteration_bounds = array<i64: 1>, scalar_prefetch = 0 : i64, scratch_operands = 0 : i64, tpu.core_type = #tpu.core_type<tc>, window_params = [{transform_indices = @transform_0, window_bounds = array<i64: 16, 32>}, {pipeline_mode = #tpu.pipeline_mode<synchronous>, transform_indices = @transform_1, window_bounds = array<i64: 32, 256>}, {pipeline_mode = #tpu.pipeline_mode<synchronous>, transform_indices = @transform_2, window_bounds = array<i64: 1, 256>}, {transform_indices = @transform_3, window_bounds = array<i64: 16, 128>}]} {
    %c0 = arith.constant 0 : index
    %c0_0 = arith.constant 0 : index
    %0 = vector.load %arg1[%c0, %c0_0] : memref<16x32xf32, #tpu.memory_space<vmem>>, vector<16x32xf32>
    %c0_1 = arith.constant 0 : index
    %c0_2 = arith.constant 0 : index
    %1 = vector.load %arg2[%c0_1, %c0_2] : memref<32x256xf32, #tpu.memory_space<vmem>>, vector<32x256xf32>
    %cst = arith.constant dense<0.000000e+00> : vector<16x256xf32>
    %2 = tpu.matmul %0, %1, %cst {dimension_numbers = #tpu.dot_dimension_numbers<[1], [0], [0], [1], [0, 0, 1, 1], [], []>} : vector<16x32xf32>, vector<32x256xf32>, vector<16x256xf32> -> vector<16x256xf32>
    %c0_3 = arith.constant 0 : index
    %c0_4 = arith.constant 0 : index
    %3 = vector.load %arg3[%c0_3, %c0_4] : memref<1x256xf32, #tpu.memory_space<vmem>>, vector<1x256xf32>
    %4 = vector.broadcast %3 : vector<1x256xf32> to vector<16x256xf32>
    %5 = arith.addf %2, %4 : vector<16x256xf32>
    %6 = vector.extract_strided_slice %5 {offsets = [0, 0], sizes = [16, 128], strides = [1, 1]} : vector<16x256xf32> to vector<16x128xf32>
    %cst_5 = arith.constant 0.000000e+00 : f32
    %7 = vector.broadcast %cst_5 : f32 to vector<16x128xf32>
    %8 = arith.maximumf %6, %7 : vector<16x128xf32>
    %9 = vector.extract_strided_slice %5 {offsets = [0, 128], sizes = [16, 128], strides = [1, 1]} : vector<16x256xf32> to vector<16x128xf32>
    %10 = arith.addf %8, %9 : vector<16x128xf32>
    %c0_6 = arith.constant 0 : index
    %c0_7 = arith.constant 0 : index
    %11 = vector.load %arg4[%c0_6, %c0_7] : memref<16x128xf32, #tpu.memory_space<vmem>>, vector<16x128xf32>
    tpu.vector_store %arg4[%c0_6, %c0_7], %10 {strides = array<i32>} : memref<16x128xf32, #tpu.memory_space<vmem>>, vector<16x128xf32>,
    return
  }
  func.func @transform_0(%arg0: i32) -> (i32, i32) {
    %c0_i32 = arith.constant 0 : i32
    %c0_i32_0 = arith.constant 0 : i32
    return %arg0, %c0_i32 : i32, i32
  }
  func.func @transform_1(%arg0: i32) -> (i32, i32) {
    %c0_i32 = arith.constant 0 : i32
    %c0_i32_0 = arith.constant 0 : i32
    %c0_i32_1 = arith.constant 0 : i32
    return %c0_i32, %c0_i32_0 : i32, i32
  }
  func.func @transform_2(%arg0: i32) -> (i32, i32) {
    %c0_i32 = arith.constant 0 : i32
    %c0_i32_0 = arith.constant 0 : i32
    %c0_i32_1 = arith.constant 0 : i32
    return %c0_i32, %c0_i32_0 : i32, i32
  }
  func.func @transform_3(%arg0: i32) -> (i32, i32) {
    %c0_i32 = arith.constant 0 : i32
    %c0_i32_0 = arith.constant 0 : i32
    return %arg0, %c0_i32 : i32, i32
  }
}

</mosaic_0001>

<bundles_post_ra>
// kernel: tpu_custom_call.1
= control target key start
LH: loop header
LB: loop body
LE: loop exit
PB: predicated region body
PF: predicated region fallthrough
CT: control target
= control target key end

     0   :  { %8 = vsyncpa [#allocation3], 0  ;;  %s323_s0 = inlined_call_operand.hbm [shape: f32[16,32], index: 0, kind: input, shape index: {}]   ;;  %s324_s1 = inlined_call_operand.hbm [shape: f32[32,256], index: 1, kind: input, shape index: {}]   ;;  %s325_s2 = inlined_call_operand.hbm [shape: f32[1,256], index: 2, kind: input, shape index: {}]   ;;  %s326_s3 = inlined_call_operand.hbm [shape: f32[16,128], index: 3, kind: output, shape index: {}]  }
   0x1   :  { %9 = vsyncpa [#allocation6], 0  ;;  %s28_s14 = sshll.u32 %s324_s1, 4  ;;  %s29_s14 = int_to_ptr.hbm [resolvable:$true] %s28_s14 }
   0x2   :  { %10 = vsyncpa [#allocation4], 0  ;;  %s277_s15 = smov [#allocation5]   ;;  %s15_s19 = sshll.u32 %s323_s0, 4  ;;  %s16_s19 = int_to_ptr.hbm [resolvable:$true] %s15_s19 }
   0x3   :  { %s30_s16 = sshll.u32 %s277_s15, 4  ;;  %s278_s20 = smov 256   ;;  %s31_s16 = int_to_ptr.vmem [resolvable:$true] %s30_s16 }
   0x4   :  { %s279_s21 = smov 16   ;;  %s280_s22 = smov [#allocation2]  }
   0x5   :  { %36 = dma.hbm_to_vmem [thread:$0]  %s29_s14, 1024, %s31_s16, [#allocation6], %s278_s20, %s278_s20, %s279_s21  }
   0x6   :  { %s17_s23 = sshll.u32 %s280_s22, 4  ;;  %s281_s24 = smov 128   ;;  %s18_s23 = int_to_ptr.vmem [resolvable:$true] %s17_s23 }
   0x7   :  { %s282_s25 = smov 8   ;;  %s42_s27 = sshll.u32 %s325_s2, 4  ;;  %s43_s27 = int_to_ptr.hbm [resolvable:$true] %s42_s27 }
   0x8   :  { %23 = dma.hbm_to_vmem [thread:$0]  %s16_s19, 256, %s18_s23, [#allocation3], %s281_s24, %s281_s24, %s282_s25  }
   0x9   :  { %s283_s28 = smov [#allocation7]  }
   0xa   :  { %s44_s0 = sshll.u32 %s283_s28, 4  ;;  %s45_s0 = int_to_ptr.vmem [resolvable:$true] %s44_s0 }
   0xb   :  { %47 = dma.hbm_to_vmem [thread:$0]  %s43_s27, 32, %s45_s0, [#allocation6]  }
   0xc   :  { %271 = dma.done.wait [#allocation3], 256  }
   0xd   :  { %272 = vsyncadd [#allocation3], 4294967040 }
   0xe   :  { %273 = dma.done.wait [#allocation6], 1056  }
   0xf   :  { %274 = vsyncadd [#allocation6], 4294966240  ;;  %v68_v0 = vld [vmem:[#allocation5 + $0x30] sm:$0xff]  ;;  %v66_v1 = vld [vmem:[#allocation5 + $0x20] sm:$0xff]  ;;  %vm76_vm0 = vcmask 261120   ;;  %s284_s2 = smov [#allocation8]  }
  0x10   :  { %v69_v2 = vld [vmem:[#allocation5 + $0x38] sm:$0xff]  ;;  %159 = vmatpush.msra.mxu2 %v68_v0  ;;  %v67_v3 = vld [vmem:[#allocation5 + $0x28] sm:$0xff]  ;;  %v64_v4 = vld [vmem:[#allocation5 + $0x10] sm:$0xff]  ;;  %95 = vmatpush.msra.mxu0 %v68_v0  ;;  %s139_s29 = sshll.u32 %s284_s2, 4  ;;  %s141_s5 = sshll.u32 %s326_s3, 4  ;;  %s140_s29 = int_to_ptr.vmem [resolvable:$true] %s139_s29  ;;  %s142_s5 = int_to_ptr.hbm [resolvable:$true] %s141_s5 }
  0x11   :  { %163 = vmatpush.msra.mxu3 %v69_v2  ;;  %v65_v5 = vld [vmem:[#allocation5 + $0x18] sm:$0xff]  ;;  %118 = vmatpush.msra.mxu1 %v69_v2  ;;  %v62_v6 = vld [vmem:[#allocation5] sm:$0xff]  ;;  %v63_v7 = vld [vmem:[#allocation5 + $0x8] sm:$0xff] }
  0x12   :  { %160 = vmatpush.msra.mxu2 %v66_v1  ;;  %96 = vmatpush.msra.mxu0 %v66_v1  ;;  %v61_v8 = vld [vmem:[#allocation2 + $0x8] sm:$0xff]  ;;  %v60_v9 = vld [vmem:[#allocation2] sm:$0xff]  ;;  %v70_v10 = vld [vmem:[#allocation7] sm:$0x3] }
  0x13   :  { %164 = vmatpush.msra.mxu3 %v67_v3  ;;  %119 = vmatpush.msra.mxu1 %v67_v3  ;;  %v72_v11 = vperm.slane %v70_v10, 0  ;;  %v73_v12 = vperm.slane %v70_v10, 1 }
  0x14   :  { %161 = vmatpush.msra.mxu2 %v64_v4  ;;  %97 = vmatpush.msra.mxu0 %v64_v4 }
  0x15   :  { %165 = vmatpush.msra.mxu3 %v65_v5  ;;  %120 = vmatpush.msra.mxu1 %v65_v5 }
  0x16   :  { %162 = vmatpush.msra.mxu2 %v62_v6  ;;  %98 = vmatpush.msra.mxu0 %v62_v6 }
  0x17   :  { %166 = vmatpush.msra.mxu3 %v63_v7  ;;  %156 = vmatmul.msk.f32.vlgmr.msra.gmra.mxu2 %vm76_vm0, %v61_v8 }
  0x18   :  { %158 = vmatmul.msk.f32.vlgmr.msra.gmra.mxu3 %vm76_vm0, %v61_v8  ;;  %121 = vmatpush.msra.mxu1 %v63_v7 }
  0x19   :  { %155 = vmatmul.msk.f32.vlgmr.msra.gmra.mxu0 %vm76_vm0, %v60_v9  ;;  %157 = vmatmul.msk.f32.vlgmr.msra.gmra.mxu1 %vm76_vm0, %v60_v9 }
  0x96   :  { %v100_v13 = vpop.f32.mrf.mxu0  ;;  %v123_v14 = vpop.f32.mrf.mxu1 }
  0x97   :  { %v101_v15 = vadd.f32 %v100_v13, %v72_v11  ;;  %v124_v16 = vadd.f32 %v123_v14, %v73_v12 }
  0x99   :  { %v129_v17 = vmax.f32 %v101_v15, 0.0 }
  0x9a   :  { %v103_v18 = vpop.f32.mrf.mxu2 }
  0x9b   :  { %v126_v19 = vpop.f32.mrf.mxu3  ;;  %v104_v20 = vadd.f32 %v103_v18, %v72_v11  ;;  %v131_v21 = vadd.f32 %v129_v17, %v124_v16 }
  0x9c   :  { %v127_v22 = vadd.f32 %v126_v19, %v73_v12 }
  0x9d   :  { %v130_v23 = vmax.f32 %v104_v20, 0.0  ;;  %133 = vst [vmem:[#allocation8] sm:$0xff] %v131_v21 }
  0x9f   :  { %v132_v24 = vadd.f32 %v130_v23, %v127_v22 }
  0xa1   :  { %134 = vst [vmem:[#allocation8 + $0x8] sm:$0xff] %v132_v24 }
  0xa2   :  { %147 = dma.vmem_to_hbm [thread:$0]  %s140_s29, 256, %s142_s5, [#allocation4], %s281_s24, %s281_s24, %s282_s25  }
  0xa3   :  { %275 = dma.done.wait [#allocation4], 256  }
  0xa4   :  { %276 = vsyncadd [#allocation4], 4294967040 }
  0xa5   :  { %152 = vsyncpa [#allocation3], 1 }
  0xa6   :  { %153 = vsyncpa [#allocation6], 1 }
  0xa7   :  { %154 = vsyncpa [#allocation4], 1 }

</bundles_post_ra>
